<compile_context>
chip_gen: v6e
topology: v6e:2x2x1
jax: 0.10.0
libtpu: 0.0.40
codegen_flags: <defaults>
</compile_context>

<pallas_src>
import functools

import numpy as np

import jax
import jax.numpy as jnp
from jax.experimental import pallas as pl
from jax.experimental.pallas import tpu as pltpu


def _round_up(v, m):
    return ((v + m - 1) // m) * m


# ---------------------------------------------------------------------------
# Mish(x) = x * tanh(softplus(x)).  With e = exp(min(x, 20)) and u = 1 + e:
#   tanh(softplus(x)) = (u^2 - 1) / (u^2 + 1) = e*(e+2) / (e*(e+2) + 2)
# The right-hand form has no cancellation for negative x.  exp and the approx
# reciprocal go to the EUP (free slot); the Newton step is one VPU fma-pair.
# ---------------------------------------------------------------------------
def _mish(x):
    e = jnp.exp(jnp.minimum(x, 20.0))      # for x > 20 the ratio is 1.0 in f32
    num = e * (e + 2.0)
    den = num + 2.0
    r = pl.reciprocal(den, approx=True)
    r = r * (2.0 - den * r)                # one Newton step -> ~full f32 precision
    return x * num * r


# ---------------------------------------------------------------------------
# Kernel: the whole fused forward for one batch tile.
#   level_meta: static tuple of (row_offset, k_rows_used, n_new, masked).
# ---------------------------------------------------------------------------
def _fused_kernel(level_meta, lane, x_ref, wpack_ref, bpack_ref, out_ref):
    h = x_ref[...].astype(jnp.float32)                       # (tb, D)
    biases = bpack_ref[...].astype(jnp.float32)              # (8, lane), one vreg
    # Hoisted column index: one (1, lane) iota reused by every masked level.
    col = jax.lax.broadcasted_iota(jnp.int32, (1, lane), 1)

    for lvl, (off, k, n_new, masked) in enumerate(level_meta):
        w = wpack_ref[off:off + k, :]                        # aligned (k, lane) slice
        b = biases[lvl:lvl + 1, :]                           # (1, lane)
        lin = jnp.dot(h.astype(w.dtype), w,
                      preferred_element_type=jnp.float32) + b
        if masked:
            # Only freshly computed columns (< n_new) get the activation; the
            # identity-passthrough columns (finished branches) keep their value.
            # Zero-padded columns are 0 on both sides of the select.
            h = jnp.where(col < n_new, _mish(lin), lin)
        else:
            h = _mish(lin)                                   # padded cols: Mish(0)=0

    out_ref[...] = h[:, 0:1].astype(out_ref.dtype)           # (tb, 1)


# ---------------------------------------------------------------------------
# Host-side weight fusion (done once, outside the kernel).
# ---------------------------------------------------------------------------
def _build_levels(params):
    """Turn the per-branch params into 6 fused (W, b, n_new) levels."""
    n_branch_layers = (5, 4, 3, 2, 1)
    branches, idx = [], 0
    for n in n_branch_layers:
        branches.append(params[idx:idx + n])
        idx += n
    Wi, bi = params[idx]                                     # (5, 1), (1, 1)

    levels = []

    # Level 1: all branches consume the same x -> horizontal weight concat.
    W1 = np.concatenate([np.asarray(br[0][0], np.float32) for br in branches], axis=1)
    b1 = np.concatenate([np.asarray(br[0][1], np.float32) for br in branches], axis=1)
    levels.append((W1, b1, W1.shape[1]))

    # Levels 2..5: block-diagonal over still-active branches, identity
    # passthrough (weight 1, bias 0, no Mish) for finished branches.
    for lvl in range(2, 6):
        active = [br for br in branches if len(br) >= lvl]
        n_active = len(active)
        # Invariant: active (deeper) branches are a strict prefix of `branches`,
        # so packed columns are [fresh outputs ..., finished passthroughs ...]
        # and the lane mask in the kernel never re-activates a finished branch.
        assert all(len(br) >= lvl for br in branches[:n_active])
        assert all(len(br) < lvl for br in branches[n_active:])
        n_done = len(branches) - n_active
        in_w = [np.asarray(br[lvl - 1][0]).shape[0] for br in active] + [1] * n_done
        out_w = [np.asarray(br[lvl - 1][0]).shape[1] for br in active] + [1] * n_done
        K, N = sum(in_w), sum(out_w)
        W = np.zeros((K, N), np.float32)
        b = np.zeros((1, N), np.float32)
        r = c = 0
        for br in active:
            Wj = np.asarray(br[lvl - 1][0], np.float32)
            bj = np.asarray(br[lvl - 1][1], np.float32)
            W[r:r + Wj.shape[0], c:c + Wj.shape[1]] = Wj
            b[:, c:c + Wj.shape[1]] = bj
            r += Wj.shape[0]
            c += Wj.shape[1]
        n_new = c
        for _ in range(n_done):
            W[r, c] = 1.0
            r += 1
            c += 1
        levels.append((W, b, n_new))

    # Level 6: integrate Linear(5, 1) + Mish.  The level-5 output columns are
    # already ordered [x5, x4, x3, x2, x1], matching the torch concat.
    levels.append((np.asarray(Wi, np.float32), np.asarray(bi, np.float32), 1))
    return levels


def _pack_levels(levels, input_dim, weights_dtype=jnp.float32):
    """Pack level weights into one fully tile-aligned (rows, lane) array.

    Level 1 occupies (round_up(D,16), lane); levels 2..6 occupy (lane, lane).
    All offsets are multiples of 16, so every in-kernel slice is aligned.
    Biases go into a single (8, lane) array (one row per level).
    """
    n1 = levels[0][0].shape[1]
    lane = max(128, _round_up(n1, 128))
    kp1 = _round_up(max(input_dim, 1), 16)

    rows = kp1 + (len(levels) - 1) * lane
    wpack = np.zeros((rows, lane), np.float32)
    bpack = np.zeros((8, lane), np.float32)
    meta = []

    off = 0
    for lvl, (W, b, n_new) in enumerate(levels):
        K, N = W.shape
        assert N <= lane, "hidden width exceeds packed lane width"
        if lvl == 0:
            assert K == input_dim
            k_alloc, k_used = kp1, K           # dot uses exactly D rows
        else:
            assert K <= lane
            k_alloc = k_used = lane            # zero rows are inert (h cols are 0)
        wpack[off:off + K, :N] = W
        bpack[lvl, :N] = b[0]
        # Levels 2..5 carry finished-branch passthrough columns -> mask needed.
        masked = (lvl >= 1) and (lvl < len(levels) - 1)
        meta.append((off, k_used, n_new, masked))
        off += k_alloc

    return (jnp.asarray(wpack, dtype=weights_dtype),
            jnp.asarray(bpack, dtype=jnp.float32),
            tuple(meta), lane)


# ---------------------------------------------------------------------------
# VMEM budget / batch-tile selection.
# ---------------------------------------------------------------------------
def _vmem_budget_bytes():
    try:
        cap = int(pltpu.get_tpu_info().vmem_capacity_bytes)
    except Exception:
        cap = 64 * 1024 * 1024       # conservative fallback = v7x physical per-TC VMEM
    # Leave headroom for compiler scratch; never ask for more than ~100 MiB.
    return min(int(cap * 0.70), 100 * 1024 * 1024)


def _choose_tb(B, D, lane, wpack_nbytes, bpack_nbytes, vmem_budget):
    fixed = 2 * (wpack_nbytes + bpack_nbytes) + (1 << 20)     # dbuf'd weights + slack
    # Per batch row: double-buffered x tile + ~8 live (row, lane) f32
    # intermediates (h, lin, mish temps, select) + padded (row,1) out dbuf.
    per_row = 2 * D * 4 + 8 * lane * 4 + 2 * 128 * 4
    avail = max(vmem_budget - fixed, 64 * per_row)
    tb = min(avail // per_row, 4096, _round_up(B, 8))
    tb = max(8, (tb // 8) * 8)
    # Give megacore parts (v7x, 2 TCs) at least two grid steps to shard once
    # the batch is big enough that splitting costs nothing.
    if tb >= B and B >= 512:
        tb = _round_up((B + 1) // 2, 8)
    return int(tb)


# ---------------------------------------------------------------------------
# Public forward.
# ---------------------------------------------------------------------------
def my_sequential_forward(x, params, *, tb=None, weights_dtype=jnp.float32):
    """x: (B, input_dim) f32.  params: list of (W, b) pairs (see init_params).

    weights_dtype=jnp.bfloat16 halves weight traffic / uses the bf16 MXU path
    (useful on v5e); keep f32 when ~1e-4 absolute accuracy is required.
    """
    B, D = x.shape
    levels = _build_levels(params)
    wpack, bpack, meta, lane = _pack_levels(levels, D, weights_dtype)

    vmem_budget = _vmem_budget_bytes()
    if tb is None:
        tb = _choose_tb(B, D, lane,
                        wpack.size * wpack.dtype.itemsize,
                        bpack.size * bpack.dtype.itemsize,
                        vmem_budget)
    tb = max(8, _round_up(int(tb), 8))

    B_pad = _round_up(B, tb)
    xp = jnp.pad(x, ((0, B_pad - B), (0, 0))) if B_pad != B else x
    grid = (B_pad // tb,)

    out = pl.pallas_call(
        functools.partial(_fused_kernel, meta, lane),
        out_shape=jax.ShapeDtypeStruct((B_pad, 1), x.dtype),
        grid_spec=pltpu.PrefetchScalarGridSpec(
            num_scalar_prefetch=0,
            grid=grid,
            in_specs=[
                pl.BlockSpec((tb, D), lambda i: (i, 0)),
                pl.BlockSpec(wpack.shape, lambda i: (0, 0)),
                pl.BlockSpec(bpack.shape, lambda i: (0, 0)),
            ],
            out_specs=pl.BlockSpec((tb, 1), lambda i: (i, 0)),
        ),
        compiler_params=pltpu.CompilerParams(
            dimension_semantics=("parallel",),
            vmem_limit_bytes=int(vmem_budget),
        ),
    )(xp, wpack, bpack)
    return out[:B]


# ---------------------------------------------------------------------------
# Deterministic init matching torch.nn.Linear default U(-1/sqrt(in), 1/sqrt(in)).
# Weights stored pre-transposed as (in_features, out_features).
# ---------------------------------------------------------------------------
def init_params(key, input_dim, ratio=2):
    dims_branches = [
        [input_dim, int(16 * ratio), int(8 * ratio), int(4 * ratio), int(2 * ratio), 1],
        [input_dim, int(8 * ratio), int(4 * ratio), int(2 * ratio), 1],
        [input_dim, int(4 * ratio), int(2 * ratio), 1],
        [input_dim, int(2 * ratio), 1],
        [input_dim, 1],
    ]
    params = []
    for dims in dims_branches:
        for din, dout in zip(dims[:-1], dims[1:]):
            key, k1, k2 = jax.random.split(key, 3)
            bound = 1.0 / float(np.sqrt(float(din)))
            W = jax.random.uniform(k1, (din, dout), jnp.float32, -bound, bound)
            b = jax.random.uniform(k2, (1, dout), jnp.float32, -bound, bound)
            params.append((W, b))
    # integrate_layers: Linear(5, 1); stored pre-transposed as (5, 1).
    key, k1, k2 = jax.random.split(key, 3)
    bound = 1.0 / float(np.sqrt(5.0))
    Wi = jax.random.uniform(k1, (5, 1), jnp.float32, -bound, bound)
    bi = jax.random.uniform(k2, (1, 1), jnp.float32, -bound, bound)
    params.append((Wi, bi))
    return params


# ---------------------------------------------------------------------------
# Pure-JAX reference reproducing the PyTorch forward exactly.
# ---------------------------------------------------------------------------
def reference_forward(x, params):
    def mish(v):
        return v * jnp.tanh(jnp.logaddexp(v, 0.0))

    idx, outs = 0, []
    for n_layers in (5, 4, 3, 2, 1):
        h = x
        for _ in range(n_layers):
            W, b = params[idx]
            idx += 1
            h = mish(h @ W + b)
        outs.append(h)
    Wi, bi = params[idx]                       # (5, 1), (1, 1)
    cat = jnp.concatenate(outs, axis=1)        # (B, 5) == torch.concat dim=1
    return mish(cat @ Wi + bi)                 # (B, 1)


if __name__ == "__main__":
    key = jax.random.PRNGKey(0)
    kx, kx2, kp = jax.random.split(key, 3)

    D = 32
    params = init_params(kp, D, ratio=2)

    # Small demo batch (single grid step).
    B = 16
    x = jax.random.normal(kx, (B, D), dtype=jnp.float32)
    y = jax.block_until_ready(my_sequential_forward(x, params))
    y_ref = reference_forward(x, params)
    assert y.shape == (B, 1)
    assert jnp.allclose(y, y_ref, atol=1e-4, rtol=1e-4), "mismatch vs reference (small)"

    # Medium batch: exercises batch padding and the multi-step "parallel" grid.
    B2 = 600
    x2 = jax.random.normal(kx2, (B2, D), dtype=jnp.float32)
    y2 = jax.block_until_ready(my_sequential_forward(x2, params))
    y2_ref = reference_forward(x2, params)
    assert y2.shape == (B2, 1)
    assert jnp.allclose(y2, y2_ref, atol=1e-4, rtol=1e-4), "mismatch vs reference (medium)"

    print("KERNEL_OK")
</pallas_src>

<mosaic_0001>
module attributes {stable_mosaic.version = 11 : i64} {
  func.func @_fused_kernel(%arg0: i32, %arg1: memref<16x32xf32, #tpu.memory_space<vmem>>, %arg2: memref<672x128xf32, #tpu.memory_space<vmem>>, %arg3: memref<8x128xf32, #tpu.memory_space<vmem>>, %arg4: memref<16x1xf32, #tpu.memory_space<vmem>>) attributes {dimension_semantics = [#tpu.dimension_semantics<parallel>], iteration_bounds = array<i64: 1>, scalar_prefetch = 0 : i64, scratch_operands = 0 : i64, tpu.core_type = #tpu.core_type<tc>, window_params = [{transform_indices = @transform_0, window_bounds = array<i64: 16, 32>}, {pipeline_mode = #tpu.pipeline_mode<synchronous>, transform_indices = @transform_1, window_bounds = array<i64: 672, 128>}, {pipeline_mode = #tpu.pipeline_mode<synchronous>, transform_indices = @transform_2, window_bounds = array<i64: 8, 128>}, {transform_indices = @transform_3, window_bounds = array<i64: 16, 1>}]} {
    %c0 = arith.constant 0 : index
    %c0_0 = arith.constant 0 : index
    %0 = vector.load %arg1[%c0, %c0_0] : memref<16x32xf32, #tpu.memory_space<vmem>>, vector<16x32xf32>
    %c0_1 = arith.constant 0 : index
    %c0_2 = arith.constant 0 : index
    %1 = vector.load %arg3[%c0_1, %c0_2] : memref<8x128xf32, #tpu.memory_space<vmem>>, vector<8x128xf32>
    %2 = tpu.iota {dimensions = array<i32: 1>} : vector<1x128xi32>
    %c0_3 = arith.constant 0 : index
    %c0_4 = arith.constant 0 : index
    %3 = vector.load %arg2[%c0_3, %c0_4] : memref<672x128xf32, #tpu.memory_space<vmem>>, vector<32x128xf32>
    %4 = vector.extract_strided_slice %1 {offsets = [0, 0], sizes = [1, 128], strides = [1, 1]} : vector<8x128xf32> to vector<1x128xf32>
    %cst = arith.constant dense<0.000000e+00> : vector<16x128xf32>
    %5 = tpu.matmul %0, %3, %cst {dimension_numbers = #tpu.dot_dimension_numbers<[1], [0], [0], [1], [0, 0, 1, 1], [], []>} : vector<16x32xf32>, vector<32x128xf32>, vector<16x128xf32> -> vector<16x128xf32>
    %6 = vector.broadcast %4 : vector<1x128xf32> to vector<16x128xf32>
    %7 = arith.addf %5, %6 : vector<16x128xf32>
    %cst_5 = arith.constant 2.000000e+01 : f32
    %8 = vector.broadcast %cst_5 : f32 to vector<16x128xf32>
    %9 = arith.minimumf %7, %8 : vector<16x128xf32>
    %10 = math.exp %9 : vector<16x128xf32>
    %cst_6 = arith.constant 2.000000e+00 : f32
    %11 = vector.broadcast %cst_6 : f32 to vector<16x128xf32>
    %12 = arith.addf %10, %11 : vector<16x128xf32>
    %13 = arith.mulf %10, %12 : vector<16x128xf32>
    %cst_7 = arith.constant 2.000000e+00 : f32
    %14 = vector.broadcast %cst_7 : f32 to vector<16x128xf32>
    %15 = arith.addf %13, %14 : vector<16x128xf32>
    %16 = tpu.reciprocal %15 {approx = true} : vector<16x128xf32> -> vector<16x128xf32>
    %17 = arith.mulf %15, %16 : vector<16x128xf32>
    %cst_8 = arith.constant 2.000000e+00 : f32
    %18 = vector.broadcast %cst_8 : f32 to vector<16x128xf32>
    %19 = arith.subf %18, %17 : vector<16x128xf32>
    %20 = arith.mulf %16, %19 : vector<16x128xf32>
    %21 = arith.mulf %7, %13 : vector<16x128xf32>
    %22 = arith.mulf %21, %20 : vector<16x128xf32>
    %c32 = arith.constant 32 : index
    %c0_9 = arith.constant 0 : index
    %23 = vector.load %arg2[%c32, %c0_9] : memref<672x128xf32, #tpu.memory_space<vmem>>, vector<128x128xf32>
    %24 = vector.extract_strided_slice %1 {offsets = [1, 0], sizes = [1, 128], strides = [1, 1]} : vector<8x128xf32> to vector<1x128xf32>
    %cst_10 = arith.constant dense<0.000000e+00> : vector<16x128xf32>
    %25 = tpu.matmul %22, %23, %cst_10 {dimension_numbers = #tpu.dot_dimension_numbers<[1], [0], [0], [1], [0, 0, 1, 1], [], []>} : vector<16x128xf32>, vector<128x128xf32>, vector<16x128xf32> -> vector<16x128xf32>
    %26 = vector.broadcast %24 : vector<1x128xf32> to vector<16x128xf32>
    %27 = arith.addf %25, %26 : vector<16x128xf32>
    %c29_i32 = arith.constant 29 : i32
    %28 = vector.broadcast %c29_i32 : i32 to vector<1x128xi32>
    %29 = arith.cmpi slt, %2, %28 : vector<1x128xi32>
    %cst_11 = arith.constant 2.000000e+01 : f32
    %30 = vector.broadcast %cst_11 : f32 to vector<16x128xf32>
    %31 = arith.minimumf %27, %30 : vector<16x128xf32>
    %32 = math.exp %31 : vector<16x128xf32>
    %cst_12 = arith.constant 2.000000e+00 : f32
    %33 = vector.broadcast %cst_12 : f32 to vector<16x128xf32>
    %34 = arith.addf %32, %33 : vector<16x128xf32>
    %35 = arith.mulf %32, %34 : vector<16x128xf32>
    %cst_13 = arith.constant 2.000000e+00 : f32
    %36 = vector.broadcast %cst_13 : f32 to vector<16x128xf32>
    %37 = arith.addf %35, %36 : vector<16x128xf32>
    %38 = tpu.reciprocal %37 {approx = true} : vector<16x128xf32> -> vector<16x128xf32>
    %39 = arith.mulf %37, %38 : vector<16x128xf32>
    %cst_14 = arith.constant 2.000000e+00 : f32
    %40 = vector.broadcast %cst_14 : f32 to vector<16x128xf32>
    %41 = arith.subf %40, %39 : vector<16x128xf32>
    %42 = arith.mulf %38, %41 : vector<16x128xf32>
    %43 = arith.mulf %27, %35 : vector<16x128xf32>
    %44 = arith.mulf %43, %42 : vector<16x128xf32>
    %45 = vector.shape_cast %29 : vector<1x128xi1> to vector<1x128xi1>
    %46 = vector.broadcast %45 : vector<1x128xi1> to vector<16x128xi1>
    %47 = arith.select %46, %44, %27 : vector<16x128xi1>, vector<16x128xf32>
    %c160 = arith.constant 160 : index
    %c0_15 = arith.constant 0 : index
    %48 = vector.load %arg2[%c160, %c0_15] : memref<672x128xf32, #tpu.memory_space<vmem>>, vector<128x128xf32>
    %49 = vector.extract_strided_slice %1 {offsets = [2, 0], sizes = [1, 128], strides = [1, 1]} : vector<8x128xf32> to vector<1x128xf32>
    %cst_16 = arith.constant dense<0.000000e+00> : vector<16x128xf32>
    %50 = tpu.matmul %47, %48, %cst_16 {dimension_numbers = #tpu.dot_dimension_numbers<[1], [0], [0], [1], [0, 0, 1, 1], [], []>} : vector<16x128xf32>, vector<128x128xf32>, vector<16x128xf32> -> vector<16x128xf32>
    %51 = vector.broadcast %49 : vector<1x128xf32> to vector<16x128xf32>
    %52 = arith.addf %50, %51 : vector<16x128xf32>
    %c13_i32 = arith.constant 13 : i32
    %53 = vector.broadcast %c13_i32 : i32 to vector<1x128xi32>
    %54 = arith.cmpi slt, %2, %53 : vector<1x128xi32>
    %cst_17 = arith.constant 2.000000e+01 : f32
    %55 = vector.broadcast %cst_17 : f32 to vector<16x128xf32>
    %56 = arith.minimumf %52, %55 : vector<16x128xf32>
    %57 = math.exp %56 : vector<16x128xf32>
    %cst_18 = arith.constant 2.000000e+00 : f32
    %58 = vector.broadcast %cst_18 : f32 to vector<16x128xf32>
    %59 = arith.addf %57, %58 : vector<16x128xf32>
    %60 = arith.mulf %57, %59 : vector<16x128xf32>
    %cst_19 = arith.constant 2.000000e+00 : f32
    %61 = vector.broadcast %cst_19 : f32 to vector<16x128xf32>
    %62 = arith.addf %60, %61 : vector<16x128xf32>
    %63 = tpu.reciprocal %62 {approx = true} : vector<16x128xf32> -> vector<16x128xf32>
    %64 = arith.mulf %62, %63 : vector<16x128xf32>
    %cst_20 = arith.constant 2.000000e+00 : f32
    %65 = vector.broadcast %cst_20 : f32 to vector<16x128xf32>
    %66 = arith.subf %65, %64 : vector<16x128xf32>
    %67 = arith.mulf %63, %66 : vector<16x128xf32>
    %68 = arith.mulf %52, %60 : vector<16x128xf32>
    %69 = arith.mulf %68, %67 : vector<16x128xf32>
    %70 = vector.shape_cast %54 : vector<1x128xi1> to vector<1x128xi1>
    %71 = vector.broadcast %70 : vector<1x128xi1> to vector<16x128xi1>
    %72 = arith.select %71, %69, %52 : vector<16x128xi1>, vector<16x128xf32>
    %c288 = arith.constant 288 : index
    %c0_21 = arith.constant 0 : index
    %73 = vector.load %arg2[%c288, %c0_21] : memref<672x128xf32, #tpu.memory_space<vmem>>, vector<128x128xf32>
    %74 = vector.extract_strided_slice %1 {offsets = [3, 0], sizes = [1, 128], strides = [1, 1]} : vector<8x128xf32> to vector<1x128xf32>
    %cst_22 = arith.constant dense<0.000000e+00> : vector<16x128xf32>
    %75 = tpu.matmul %72, %73, %cst_22 {dimension_numbers = #tpu.dot_dimension_numbers<[1], [0], [0], [1], [0, 0, 1, 1], [], []>} : vector<16x128xf32>, vector<128x128xf32>, vector<16x128xf32> -> vector<16x128xf32>
    %76 = vector.broadcast %74 : vector<1x128xf32> to vector<16x128xf32>
    %77 = arith.addf %75, %76 : vector<16x128xf32>
    %c5_i32 = arith.constant 5 : i32
    %78 = vector.broadcast %c5_i32 : i32 to vector<1x128xi32>
    %79 = arith.cmpi slt, %2, %78 : vector<1x128xi32>
    %cst_23 = arith.constant 2.000000e+01 : f32
    %80 = vector.broadcast %cst_23 : f32 to vector<16x128xf32>
    %81 = arith.minimumf %77, %80 : vector<16x128xf32>
    %82 = math.exp %81 : vector<16x128xf32>
    %cst_24 = arith.constant 2.000000e+00 : f32
    %83 = vector.broadcast %cst_24 : f32 to vector<16x128xf32>
    %84 = arith.addf %82, %83 : vector<16x128xf32>
    %85 = arith.mulf %82, %84 : vector<16x128xf32>
    %cst_25 = arith.constant 2.000000e+00 : f32
    %86 = vector.broadcast %cst_25 : f32 to vector<16x128xf32>
    %87 = arith.addf %85, %86 : vector<16x128xf32>
    %88 = tpu.reciprocal %87 {approx = true} : vector<16x128xf32> -> vector<16x128xf32>
    %89 = arith.mulf %87, %88 : vector<16x128xf32>
    %cst_26 = arith.constant 2.000000e+00 : f32
    %90 = vector.broadcast %cst_26 : f32 to vector<16x128xf32>
    %91 = arith.subf %90, %89 : vector<16x128xf32>
    %92 = arith.mulf %88, %91 : vector<16x128xf32>
    %93 = arith.mulf %77, %85 : vector<16x128xf32>
    %94 = arith.mulf %93, %92 : vector<16x128xf32>
    %95 = vector.shape_cast %79 : vector<1x128xi1> to vector<1x128xi1>
    %96 = vector.broadcast %95 : vector<1x128xi1> to vector<16x128xi1>
    %97 = arith.select %96, %94, %77 : vector<16x128xi1>, vector<16x128xf32>
    %c416 = arith.constant 416 : index
    %c0_27 = arith.constant 0 : index
    %98 = vector.load %arg2[%c416, %c0_27] : memref<672x128xf32, #tpu.memory_space<vmem>>, vector<128x128xf32>
    %99 = vector.extract_strided_slice %1 {offsets = [4, 0], sizes = [1, 128], strides = [1, 1]} : vector<8x128xf32> to vector<1x128xf32>
    %cst_28 = arith.constant dense<0.000000e+00> : vector<16x128xf32>
    %100 = tpu.matmul %97, %98, %cst_28 {dimension_numbers = #tpu.dot_dimension_numbers<[1], [0], [0], [1], [0, 0, 1, 1], [], []>} : vector<16x128xf32>, vector<128x128xf32>, vector<16x128xf32> -> vector<16x128xf32>
    %101 = vector.broadcast %99 : vector<1x128xf32> to vector<16x128xf32>
    %102 = arith.addf %100, %101 : vector<16x128xf32>
    %c1_i32 = arith.constant 1 : i32
    %103 = vector.broadcast %c1_i32 : i32 to vector<1x128xi32>
    %104 = arith.cmpi slt, %2, %103 : vector<1x128xi32>
    %cst_29 = arith.constant 2.000000e+01 : f32
    %105 = vector.broadcast %cst_29 : f32 to vector<16x128xf32>
    %106 = arith.minimumf %102, %105 : vector<16x128xf32>
    %107 = math.exp %106 : vector<16x128xf32>
    %cst_30 = arith.constant 2.000000e+00 : f32
    %108 = vector.broadcast %cst_30 : f32 to vector<16x128xf32>
    %109 = arith.addf %107, %108 : vector<16x128xf32>
    %110 = arith.mulf %107, %109 : vector<16x128xf32>
    %cst_31 = arith.constant 2.000000e+00 : f32
    %111 = vector.broadcast %cst_31 : f32 to vector<16x128xf32>
    %112 = arith.addf %110, %111 : vector<16x128xf32>
    %113 = tpu.reciprocal %112 {approx = true} : vector<16x128xf32> -> vector<16x128xf32>
    %114 = arith.mulf %112, %113 : vector<16x128xf32>
    %cst_32 = arith.constant 2.000000e+00 : f32
    %115 = vector.broadcast %cst_32 : f32 to vector<16x128xf32>
    %116 = arith.subf %115, %114 : vector<16x128xf32>
    %117 = arith.mulf %113, %116 : vector<16x128xf32>
    %118 = arith.mulf %102, %110 : vector<16x128xf32>
    %119 = arith.mulf %118, %117 : vector<16x128xf32>
    %120 = vector.shape_cast %104 : vector<1x128xi1> to vector<1x128xi1>
    %121 = vector.broadcast %120 : vector<1x128xi1> to vector<16x128xi1>
    %122 = arith.select %121, %119, %102 : vector<16x128xi1>, vector<16x128xf32>
    %c544 = arith.constant 544 : index
    %c0_33 = arith.constant 0 : index
    %123 = vector.load %arg2[%c544, %c0_33] : memref<672x128xf32, #tpu.memory_space<vmem>>, vector<128x128xf32>
    %124 = vector.extract_strided_slice %1 {offsets = [5, 0], sizes = [1, 128], strides = [1, 1]} : vector<8x128xf32> to vector<1x128xf32>
    %cst_34 = arith.constant dense<0.000000e+00> : vector<16x128xf32>
    %125 = tpu.matmul %122, %123, %cst_34 {dimension_numbers = #tpu.dot_dimension_numbers<[1], [0], [0], [1], [0, 0, 1, 1], [], []>} : vector<16x128xf32>, vector<128x128xf32>, vector<16x128xf32> -> vector<16x128xf32>
    %126 = vector.broadcast %124 : vector<1x128xf32> to vector<16x128xf32>
    %127 = arith.addf %125, %126 : vector<16x128xf32>
    %cst_35 = arith.constant 2.000000e+01 : f32
    %128 = vector.broadcast %cst_35 : f32 to vector<16x128xf32>
    %129 = arith.minimumf %127, %128 : vector<16x128xf32>
    %130 = math.exp %129 : vector<16x128xf32>
    %cst_36 = arith.constant 2.000000e+00 : f32
    %131 = vector.broadcast %cst_36 : f32 to vector<16x128xf32>
    %132 = arith.addf %130, %131 : vector<16x128xf32>
    %133 = arith.mulf %130, %132 : vector<16x128xf32>
    %cst_37 = arith.constant 2.000000e+00 : f32
    %134 = vector.broadcast %cst_37 : f32 to vector<16x128xf32>
    %135 = arith.addf %133, %134 : vector<16x128xf32>
    %136 = tpu.reciprocal %135 {approx = true} : vector<16x128xf32> -> vector<16x128xf32>
    %137 = arith.mulf %135, %136 : vector<16x128xf32>
    %cst_38 = arith.constant 2.000000e+00 : f32
    %138 = vector.broadcast %cst_38 : f32 to vector<16x128xf32>
    %139 = arith.subf %138, %137 : vector<16x128xf32>
    %140 = arith.mulf %136, %139 : vector<16x128xf32>
    %141 = arith.mulf %127, %133 : vector<16x128xf32>
    %142 = arith.mulf %141, %140 : vector<16x128xf32>
    %143 = vector.extract_strided_slice %142 {offsets = [0, 0], sizes = [16, 1], strides = [1, 1]} : vector<16x128xf32> to vector<16x1xf32>
    %c0_39 = arith.constant 0 : index
    %c0_40 = arith.constant 0 : index
    %144 = vector.load %arg4[%c0_39, %c0_40] : memref<16x1xf32, #tpu.memory_space<vmem>>, vector<16x1xf32>
    tpu.vector_store %arg4[%c0_39, %c0_40], %143 {strides = array<i32>} : memref<16x1xf32, #tpu.memory_space<vmem>>, vector<16x1xf32>,
    return
  }
  func.func @transform_0(%arg0: i32) -> (i32, i32) {
    %c0_i32 = arith.constant 0 : i32
    %c0_i32_0 = arith.constant 0 : i32
    return %arg0, %c0_i32 : i32, i32
  }
  func.func @transform_1(%arg0: i32) -> (i32, i32) {
    %c0_i32 = arith.constant 0 : i32
    %c0_i32_0 = arith.constant 0 : i32
    %c0_i32_1 = arith.constant 0 : i32
    return %c0_i32, %c0_i32_0 : i32, i32
  }
  func.func @transform_2(%arg0: i32) -> (i32, i32) {
    %c0_i32 = arith.constant 0 : i32
    %c0_i32_0 = arith.constant 0 : i32
    %c0_i32_1 = arith.constant 0 : i32
    return %c0_i32, %c0_i32_0 : i32, i32
  }
  func.func @transform_3(%arg0: i32) -> (i32, i32) {
    %c0_i32 = arith.constant 0 : i32
    %c0_i32_0 = arith.constant 0 : i32
    return %arg0, %c0_i32 : i32, i32
  }
}

</mosaic_0001>

<bundles_post_ra>
// kernel: tpu_custom_call.1
= control target key start
LH: loop header
LB: loop body
LE: loop exit
PB: predicated region body
PF: predicated region fallthrough
CT: control target
= control target key end

     0   :  { %8 = vsyncpa [#allocation3], 0  ;;  %s1263_s0 = inlined_call_operand.hbm [shape: f32[16,32], index: 0, kind: input, shape index: {}]   ;;  %s1264_s1 = inlined_call_operand.hbm [shape: f32[672,128], index: 1, kind: input, shape index: {}]   ;;  %s1265_s2 = inlined_call_operand.hbm [shape: f32[8,128], index: 2, kind: input, shape index: {}]   ;;  %s1266_s3 = inlined_call_operand.vmem [shape: f32[16,1], index: 3, kind: output, shape index: {}]  }
   0x1   :  { %9 = vsyncpa [#allocation5], 0  ;;  %s1197_s12 = smov [#allocation4]   ;;  %s1198_s14 = smov [#allocation2]  }
   0x2   :  { %s27_s13 = sshll.u32 %s1197_s12, 4  ;;  %s15_s15 = sshll.u32 %s1198_s14, 4  ;;  %s28_s13 = int_to_ptr.vmem [resolvable:$true] %s27_s13  ;;  %s16_s15 = int_to_ptr.vmem [resolvable:$true] %s15_s15 }
   0x3   :  { %s1141_s16 = scalar_lea.vmem %s28_s13, 10752  ;;  %p1146_p1 = scmp.lt.s32.totalorder %s28_s13, %s28_s13 }
   0x4   :  { %p1142_p0 = scmp.ne.s32.totalorder %s28_s13, %s1141_s16  ;;  %p1147_p2 = scmp.lt.s32.totalorder %s1141_s16, %s1141_s16 }
   0x6   :  { %p1148_p3 = por %p1147_p2, %p1146_p1 }
   0x8   :  { %p1149_p4 = pnand %p1148_p3, %p1142_p0 }
   0xa   :  { %1152 = shalt.err (!%p1149_p4)
}
   0xb   :  { %s1199_s17 = smov 128   ;;  %s1200_s18 = smov 8  }
   0xc   :  { %33 = dma.hbm_to_vmem [thread:$0]  %s1264_s1, 10752, %s28_s13, [#allocation5], %s1199_s17, %s1199_s17, %s1200_s18  }
   0xd   :  { %s1161_s21 = scalar_lea.vmem %s16_s15, 256  ;;  %p1166_p6 = scmp.lt.s32.totalorder %s16_s15, %s16_s15 }
   0xe   :  { %p1162_p5 = scmp.ne.s32.totalorder %s16_s15, %s1161_s21  ;;  %p1167_p7 = scmp.lt.s32.totalorder %s1161_s21, %s1161_s21 }
  0x10   :  { %p1168_p8 = por %p1167_p7, %p1166_p6 }
  0x12   :  { %p1169_p9 = pnand %p1168_p8, %p1162_p5 }
  0x14   :  { %1172 = shalt.err (!%p1169_p9)
}
  0x15   :  { %21 = dma.hbm_to_vmem [thread:$0]  %s1263_s0, 256, %s16_s15, [#allocation3], %s1199_s17, %s1199_s17, %s1200_s18  }
  0x16   :  { %s1201_s24 = smov [#allocation6]  }
  0x17   :  { %s40_s25 = sshll.u32 %s1201_s24, 4  ;;  %s41_s25 = int_to_ptr.vmem [resolvable:$true] %s40_s25 }
  0x18   :  { %s1181_s26 = scalar_lea.vmem %s41_s25, 128  ;;  %p1186_p11 = scmp.lt.s32.totalorder %s41_s25, %s41_s25 }
  0x19   :  { %p1182_p10 = scmp.ne.s32.totalorder %s41_s25, %s1181_s26  ;;  %p1187_p12 = scmp.lt.s32.totalorder %s1181_s26, %s1181_s26 }
  0x1b   :  { %p1188_p13 = por %p1187_p12, %p1186_p11 }
  0x1d   :  { %p1189_p0 = pnand %p1188_p13, %p1182_p10 }
  0x1f   :  { %1192 = shalt.err (!%p1189_p0)
}
  0x20   :  { %43 = dma.hbm_to_vmem [thread:$0]  %s1265_s2, 128, %s41_s25, [#allocation5]  }
  0x21   :  { %1193 = dma.done.wait [#allocation3], 256  }
  0x22   :  { %1194 = vsyncadd [#allocation3], 4294967040 }
  0x23   :  { %1195 = dma.done.wait [#allocation5], 10880  }
  0x24   :  { %1196 = vsyncadd [#allocation5], 4294956416  ;;  %vm66_vm0 = vcmask 261120   ;;  %v61_v0 = vld [vmem:[#allocation4 + $0x18] sm:$0xff]  ;;  %v60_v1 = vld [vmem:[#allocation4 + $0x10] sm:$0xff]  ;;  %v56_v22 = vlaneseq  ;;  %vm787_vm5 = vcmask 7168  }
  0x25   :  { %894 = vmatprep.subr.mxu0 %v61_v0  ;;  %v53_v2 = vld [vmem:[#allocation2] sm:$0xff]  ;;  %v59_v3 = vld [vmem:[#allocation4 + $0x8] sm:$0xff]  ;;  %v58_v4 = vld [vmem:[#allocation4] sm:$0xff] }
  0x26   :  { %895 = vmatpush3.msra.mxu0 %v61_v0  ;;  %902 = vmatprep.mubr.msk.f32.mxu0 %vm66_vm0, %v53_v2  ;;  %v54_v5 = vld [vmem:[#allocation2 + $0x8] sm:$0xff]  ;;  %v186_v7 = vld [vmem:[#allocation4 + $0x90] sm:$0xff]  ;;  %v185_v8 = vld [vmem:[#allocation4 + $0x88] sm:$0xff]  ;;  %v1234_v23 = vshrl.u32 %v56_v22, 7 }
  0x27   :  { %896 = vmatprep.subr.mxu0 %v60_v1  ;;  %v187_v6 = vld [vmem:[#allocation4 + $0x98] sm:$0xff]  ;;  %v184_v9 = vld [vmem:[#allocation4 + $0x80] sm:$0xff]  ;;  %v182_v11 = vld [vmem:[#allocation4 + $0x70] sm:$0xff] }
  0x28   :  { %897 = vmatpush3.msra.mxu0 %v60_v1  ;;  %905 = vmatprep.subr.mxu1 %v187_v6  ;;  %v183_v10 = vld [vmem:[#allocation4 + $0x78] sm:$0xff]  ;;  %v181_v12 = vld [vmem:[#allocation4 + $0x68] sm:$0xff]  ;;  %v180_v13 = vld [vmem:[#allocation4 + $0x60] sm:$0xff]  ;;  %v64_v24 = vsub.s32 0, %v1234_v23 }
  0x29   :  { %898 = vmatprep.subr.mxu0 %v59_v3  ;;  %906 = vmatpush3.msra.mxu1 %v187_v6  ;;  %v179_v14 = vld [vmem:[#allocation4 + $0x58] sm:$0xff]  ;;  %v178_v15 = vld [vmem:[#allocation4 + $0x50] sm:$0xff]  ;;  %v177_v16 = vld [vmem:[#allocation4 + $0x48] sm:$0xff] }
  0x2a   :  { %899 = vmatpush3.msra.mxu0 %v59_v3  ;;  %907 = vmatprep.subr.mxu1 %v186_v7  ;;  %v176_v17 = vld [vmem:[#allocation4 + $0x40] sm:$0xff]  ;;  %v175_v18 = vld [vmem:[#allocation4 + $0x38] sm:$0xff]  ;;  %v174_v19 = vld [vmem:[#allocation4 + $0x30] sm:$0xff] }
  0x2b   :  { %900 = vmatprep.subr.mxu0 %v58_v4  ;;  %908 = vmatpush3.msra.mxu1 %v186_v7  ;;  %v173_v20 = vld [vmem:[#allocation4 + $0x28] sm:$0xff]  ;;  %v172_v21 = vld [vmem:[#allocation4 + $0x20] sm:$0xff]  ;;  %v311_v55 = vld [vmem:[#allocation4 + $0x118] sm:$0xff]  ;;  %v190_v7 = vsub.s32 1, %v1234_v23 }
  0x2c   :  { %901 = vmatpush3.msra.mxu0 %v58_v4  ;;  %909 = vmatprep.subr.mxu1 %v185_v8  ;;  %v1237_v25 = vld [vmem:[#allocation6] sm:$0xff]  ;;  %v310_v56 = vld [vmem:[#allocation4 + $0x110] sm:$0xff]  ;;  %v309_v57 = vld [vmem:[#allocation4 + $0x108] sm:$0xff] }
  0x2d   :  { %903 = vmatmul.mubr.msk.f32.vlgmr.msra.gmra.mxu0 %vm66_vm0, %v54_v5  ;;  %910 = vmatpush3.msra.mxu1 %v185_v8  ;;  %v65_v26 = vrot.slane %v1237_v25, %v64_v24  ;;  %v308_v58 = vld [vmem:[#allocation4 + $0x100] sm:$0xff]  ;;  %v307_v59 = vld [vmem:[#allocation4 + $0xf8] sm:$0xff]  ;;  %v306_v60 = vld [vmem:[#allocation4 + $0xf0] sm:$0xff]  ;;  %v191_v8 = vrot.slane %v1237_v25, %v190_v7 }
  0x2e   :  { %911 = vmatprep.subr.mxu1 %v184_v9  ;;  %940 = vmatprep.subr.mxu0 %v311_v55  ;;  %v305_v61 = vld [vmem:[#allocation4 + $0xe8] sm:$0xff]  ;;  %v304_v62 = vld [vmem:[#allocation4 + $0xe0] sm:$0xff]  ;;  %v303_v63 = vld [vmem:[#allocation4 + $0xd8] sm:$0xff] }
  0x2f   :  { %912 = vmatpush3.msra.mxu1 %v184_v9  ;;  %941 = vmatpush3.msra.mxu0 %v311_v55  ;;  %v302_v0 = vld [vmem:[#allocation4 + $0xd0] sm:$0xff]  ;;  %v301_v1 = vld [vmem:[#allocation4 + $0xc8] sm:$0xff]  ;;  %v300_v2 = vld [vmem:[#allocation4 + $0xc0] sm:$0xff] }
  0x30   :  { %913 = vmatprep.subr.mxu1 %v183_v10  ;;  %942 = vmatprep.subr.mxu0 %v310_v56  ;;  %v299_v3 = vld [vmem:[#allocation4 + $0xb8] sm:$0xff]  ;;  %v298_v4 = vld [vmem:[#allocation4 + $0xb0] sm:$0xff]  ;;  %v297_v5 = vld [vmem:[#allocation4 + $0xa8] sm:$0xff] }
  0x31   :  { %914 = vmatpush3.msra.mxu1 %v183_v10  ;;  %943 = vmatpush3.msra.mxu0 %v310_v56  ;;  %v296_v6 = vld [vmem:[#allocation4 + $0xa0] sm:$0xff]  ;;  %v422_v55 = vld [vmem:[#allocation4 + $0x130] sm:$0xff]  ;;  %v421_v56 = vld [vmem:[#allocation4 + $0x128] sm:$0xff] }
  0x32   :  { %915 = vmatprep.subr.mxu1 %v182_v11  ;;  %944 = vmatprep.subr.mxu0 %v309_v57 }
  0x33   :  { %916 = vmatpush3.msra.mxu1 %v182_v11  ;;  %945 = vmatpush3.msra.mxu0 %v309_v57  ;;  %v420_v57 = vld [vmem:[#allocation4 + $0x120] sm:$0xff] }
  0x34   :  { %917 = vmatprep.subr.mxu1 %v181_v12  ;;  %946 = vmatprep.subr.mxu0 %v308_v58 }
  0x35   :  { %918 = vmatpush3.msra.mxu1 %v181_v12  ;;  %947 = vmatpush3.msra.mxu0 %v308_v58  ;;  %v314_v58 = vsub.s32 2, %v1234_v23 }
  0x36   :  { %919 = vmatprep.subr.mxu1 %v180_v13  ;;  %948 = vmatprep.subr.mxu0 %v307_v59 }
  0x37   :  { %920 = vmatpush3.msra.mxu1 %v180_v13  ;;  %949 = vmatpush3.msra.mxu0 %v307_v59  ;;  %v315_v59 = vrot.slane %v1237_v25, %v314_v58 }
  0x38   :  { %921 = vmatprep.subr.mxu1 %v179_v14  ;;  %950 = vmatprep.subr.mxu0 %v306_v60 }
  0x39   :  { %922 = vmatpush3.msra.mxu1 %v179_v14  ;;  %951 = vmatpush3.msra.mxu0 %v306_v60 }
  0x3a   :  { %923 = vmatprep.subr.mxu1 %v178_v15  ;;  %952 = vmatprep.subr.mxu0 %v305_v61 }
  0x3b   :  { %924 = vmatpush3.msra.mxu1 %v178_v15  ;;  %953 = vmatpush3.msra.mxu0 %v305_v61 }
  0x3c   :  { %925 = vmatprep.subr.mxu1 %v177_v16  ;;  %954 = vmatprep.subr.mxu0 %v304_v62 }
  0x3d   :  { %926 = vmatpush3.msra.mxu1 %v177_v16  ;;  %955 = vmatpush3.msra.mxu0 %v304_v62 }
  0x3e   :  { %927 = vmatprep.subr.mxu1 %v176_v17  ;;  %956 = vmatprep.subr.mxu0 %v303_v63 }
  0x3f   :  { %928 = vmatpush3.msra.mxu1 %v176_v17  ;;  %957 = vmatpush3.msra.mxu0 %v303_v63 }
  0x40   :  { %929 = vmatprep.subr.mxu1 %v175_v18  ;;  %958 = vmatprep.subr.mxu0 %v302_v0 }
  0x41   :  { %930 = vmatpush3.msra.mxu1 %v175_v18  ;;  %959 = vmatpush3.msra.mxu0 %v302_v0 }
  0x42   :  { %931 = vmatprep.subr.mxu1 %v174_v19  ;;  %960 = vmatprep.subr.mxu0 %v301_v1 }
  0x43   :  { %932 = vmatpush3.msra.mxu1 %v174_v19  ;;  %961 = vmatpush3.msra.mxu0 %v301_v1 }
  0x44   :  { %933 = vmatprep.subr.mxu1 %v173_v20  ;;  %962 = vmatprep.subr.mxu0 %v300_v2 }
  0x45   :  { %934 = vmatpush3.msra.mxu1 %v173_v20  ;;  %963 = vmatpush3.msra.mxu0 %v300_v2 }
  0x46   :  { %935 = vmatprep.subr.mxu1 %v172_v21  ;;  %964 = vmatprep.subr.mxu0 %v299_v3 }
  0x47   :  { %936 = vmatpush3.msra.mxu1 %v172_v21  ;;  %965 = vmatpush3.msra.mxu0 %v299_v3 }
  0x48   :  { %966 = vmatprep.subr.mxu0 %v298_v4 }
  0x49   :  { %967 = vmatpush3.msra.mxu0 %v298_v4 }
  0x4a   :  { %968 = vmatprep.subr.mxu0 %v297_v5 }
  0x4b   :  { %969 = vmatpush3.msra.mxu0 %v297_v5 }
  0x4c   :  { %970 = vmatprep.subr.mxu0 %v296_v6 }
  0x4d   :  { %971 = vmatpush3.msra.mxu0 %v296_v6 }
  0xed   :  { %v904_v27 = vpop.f32.mrf.mxu0 }
  0xee   :  { %v145_v28 = vadd.f32 %v904_v27, %v65_v26 }
  0xef   :  { %v139_v29 = vpop.f32.mrf.mxu0 }
  0xf0   :  { %v149_v30 = vmin.f32 %v145_v28, 20.0  ;;  %v140_v31 = vadd.f32 %v139_v29, %v65_v26 }
  0xf2   :  { %v152_v32 = vmul.f32 1.442695, %v149_v30  ;;  %v148_v33 = vmin.f32 %v140_v31, 20.0 }
  0xf4   :  { %1085 = vpow2.f32 %v152_v32  ;;  %v150_v34 = vmul.f32 1.442695, %v148_v33 }
  0xf6   :  { %1087 = vpow2.f32 %v150_v34  ;;  %v1243_v34 = vand.u32 127, %v56_v22  ;;  %v433_v22 = vld [vmem:[#allocation4 + $0x188] sm:$0xff] }
  0xf8   :  { %vm267_vm1 = vcmp.lt.s32.totalorder %v1243_v34, 29  ;;  %vm391_vm2 = vcmp.lt.s32.totalorder %v1243_v34, 13  ;;  %vm515_vm3 = vcmp.lt.s32.totalorder %v1243_v34, 5  ;;  %vm639_vm4 = vcmp.lt.s32.totalorder %v1243_v34, 1 }
 0x101   :  { %v1086_v35 = vpop.eup %1085 }
 0x102   :  { %v155_v36 = vadd.f32 2.0, %v1086_v35 }
 0x103   :  { %v1088_v37 = vpop.eup %1087 }
 0x104   :  { %v157_v38 = vmul.f32 %v1086_v35, %v155_v36  ;;  %v154_v39 = vadd.f32 2.0, %v1088_v37 }
 0x106   :  { %v159_v40 = vadd.f32 2.0, %v157_v38  ;;  %v156_v41 = vmul.f32 %v1088_v37, %v154_v39  ;;  %v169_v52 = vmul.f32 %v157_v38, %v145_v28 }
 0x108   :  { %1089 = vrcp.f32 %v159_v40  ;;  %v158_v42 = vadd.f32 2.0, %v156_v41  ;;  %v168_v51 = vmul.f32 %v156_v41, %v140_v31 }
 0x10a   :  { %1091 = vrcp.f32 %v158_v42 }
 0x115   :  { %v1090_v43 = vpop.eup %1089 }
 0x116   :  { %v163_v44 = vmul.f32 %v1090_v43, %v159_v40 }
 0x117   :  { %v1092_v45 = vpop.eup %1091 }
 0x118   :  { %v162_v46 = vmul.f32 %v1092_v45, %v158_v42  ;;  %v165_v47 = vsub.f32 2.0, %v163_v44  ;;  %v434_v44 = vld [vmem:[#allocation4 + $0x190] sm:$0xff] }
 0x11a   :  { %v164_v48 = vsub.f32 2.0, %v162_v46  ;;  %v167_v49 = vmul.f32 %v1090_v43, %v165_v47  ;;  %v435_v43 = vld [vmem:[#allocation4 + $0x198] sm:$0xff]  ;;  %v430_v47 = vld [vmem:[#allocation4 + $0x170] sm:$0xff] }
 0x11b   :  { %975 = vmatprep.subr.mxu1 %v435_v43  ;;  %v431_v46 = vld [vmem:[#allocation4 + $0x178] sm:$0xff] }
 0x11c   :  { %v166_v50 = vmul.f32 %v1092_v45, %v164_v48  ;;  %v171_v54 = vmul.f32 %v169_v52, %v167_v49  ;;  %v432_v45 = vld [vmem:[#allocation4 + $0x180] sm:$0xff]  ;;  %v429_v48 = vld [vmem:[#allocation4 + $0x168] sm:$0xff] }
 0x11d   :  { %v428_v49 = vld [vmem:[#allocation4 + $0x160] sm:$0xff]  ;;  %v425_v52 = vld [vmem:[#allocation4 + $0x148] sm:$0xff] }
 0x11e   :  { %v170_v53 = vmul.f32 %v168_v51, %v166_v50  ;;  %v427_v50 = vld [vmem:[#allocation4 + $0x158] sm:$0xff]  ;;  %v426_v51 = vld [vmem:[#allocation4 + $0x150] sm:$0xff] }
 0x120   :  { %937 = vmatprep.mubr.f32.mxu1 %v170_v53  ;;  %v424_v53 = vld [vmem:[#allocation4 + $0x140] sm:$0xff] }
 0x121   :  { %938 = vmatmul.mubr.f32.vlgmr.msra.gmra.mxu1 %v171_v54  ;;  %v423_v54 = vld [vmem:[#allocation4 + $0x138] sm:$0xff] }
 0x122   :  { %976 = vmatpush3.msra.mxu1 %v435_v43  ;;  %v546_v43 = vld [vmem:[#allocation4 + $0x1b0] sm:$0xff] }
 0x123   :  { %977 = vmatprep.subr.mxu1 %v434_v44 }
 0x124   :  { %978 = vmatpush3.msra.mxu1 %v434_v44  ;;  %v545_v44 = vld [vmem:[#allocation4 + $0x1a8] sm:$0xff] }
 0x125   :  { %979 = vmatprep.subr.mxu1 %v433_v22 }
 0x126   :  { %980 = vmatpush3.msra.mxu1 %v433_v22  ;;  %v544_v22 = vld [vmem:[#allocation4 + $0x1a0] sm:$0xff] }
 0x127   :  { %981 = vmatprep.subr.mxu1 %v432_v45 }
 0x128   :  { %982 = vmatpush3.msra.mxu1 %v432_v45  ;;  %v438_v45 = vsub.s32 3, %v1234_v23 }
 0x129   :  { %983 = vmatprep.subr.mxu1 %v431_v46 }
 0x12a   :  { %984 = vmatpush3.msra.mxu1 %v431_v46  ;;  %v439_v46 = vrot.slane %v1237_v25, %v438_v45 }
 0x12b   :  { %985 = vmatprep.subr.mxu1 %v430_v47 }
 0x12c   :  { %986 = vmatpush3.msra.mxu1 %v430_v47 }
 0x12d   :  { %987 = vmatprep.subr.mxu1 %v429_v48 }
 0x12e   :  { %988 = vmatpush3.msra.mxu1 %v429_v48 }
 0x12f   :  { %989 = vmatprep.subr.mxu1 %v428_v49 }
 0x130   :  { %990 = vmatpush3.msra.mxu1 %v428_v49 }
 0x131   :  { %991 = vmatprep.subr.mxu1 %v427_v50 }
 0x132   :  { %992 = vmatpush3.msra.mxu1 %v427_v50 }
 0x133   :  { %993 = vmatprep.subr.mxu1 %v426_v51 }
 0x134   :  { %994 = vmatpush3.msra.mxu1 %v426_v51 }
 0x135   :  { %995 = vmatprep.subr.mxu1 %v425_v52 }
 0x136   :  { %996 = vmatpush3.msra.mxu1 %v425_v52 }
 0x137   :  { %997 = vmatprep.subr.mxu1 %v424_v53 }
 0x138   :  { %998 = vmatpush3.msra.mxu1 %v424_v53 }
 0x139   :  { %999 = vmatprep.subr.mxu1 %v423_v54 }
 0x13a   :  { %1000 = vmatpush3.msra.mxu1 %v423_v54 }
 0x13b   :  { %1001 = vmatprep.subr.mxu1 %v422_v55 }
 0x13c   :  { %1002 = vmatpush3.msra.mxu1 %v422_v55 }
 0x13d   :  { %1003 = vmatprep.subr.mxu1 %v421_v56 }
 0x13e   :  { %1004 = vmatpush3.msra.mxu1 %v421_v56 }
 0x13f   :  { %1005 = vmatprep.subr.mxu1 %v420_v57 }
 0x140   :  { %1006 = vmatpush3.msra.mxu1 %v420_v57 }
 0x1e1   :  { %v939_v9 = vpop.f32.mrf.mxu1 }
 0x1e2   :  { %v264_v10 = vadd.f32 %v939_v9, %v191_v8 }
 0x1e3   :  { %v258_v11 = vpop.f32.mrf.mxu1 }
 0x1e4   :  { %v269_v12 = vmin.f32 %v264_v10, 20.0  ;;  %v259_v13 = vadd.f32 %v258_v11, %v191_v8 }
 0x1e6   :  { %v272_v14 = vmul.f32 1.442695, %v269_v12  ;;  %v268_v15 = vmin.f32 %v259_v13, 20.0 }
 0x1e8   :  { %1093 = vpow2.f32 %v272_v14  ;;  %v270_v16 = vmul.f32 1.442695, %v268_v15 }
 0x1ea   :  { %1095 = vpow2.f32 %v270_v16 }
 0x1f5   :  { %v1094_v17 = vpop.eup %1093 }
 0x1f6   :  { %v275_v18 = vadd.f32 2.0, %v1094_v17 }
 0x1f7   :  { %v1096_v19 = vpop.eup %1095 }
 0x1f8   :  { %v277_v20 = vmul.f32 %v1094_v17, %v275_v18  ;;  %v274_v21 = vadd.f32 2.0, %v1096_v19 }
 0x1fa   :  { %v279_v24 = vadd.f32 2.0, %v277_v20  ;;  %v276_v26 = vmul.f32 %v1096_v19, %v274_v21  ;;  %v289_v36 = vmul.f32 %v277_v20, %v264_v10 }
 0x1fc   :  { %1097 = vrcp.f32 %v279_v24  ;;  %v278_v27 = vadd.f32 2.0, %v276_v26  ;;  %v288_v37 = vmul.f32 %v276_v26, %v259_v13 }
 0x1fe   :  { %1099 = vrcp.f32 %v278_v27 }
 0x209   :  { %v1098_v28 = vpop.eup %1097 }
 0x20a   :  { %v283_v29 = vmul.f32 %v1098_v28, %v279_v24 }
 0x20b   :  { %v1100_v30 = vpop.eup %1099 }
 0x20c   :  { %v285_v31 = vsub.f32 2.0, %v283_v29  ;;  %v282_v32 = vmul.f32 %v1100_v30, %v278_v27  ;;  %v559_v29 = vld [vmem:[#allocation4 + $0x218] sm:$0xff] }
 0x20d   :  { %1010 = vmatprep.subr.mxu0 %v559_v29 }
 0x20e   :  { %v287_v33 = vmul.f32 %v1098_v28, %v285_v31  ;;  %v284_v35 = vsub.f32 2.0, %v282_v32  ;;  %v557_v31 = vld [vmem:[#allocation4 + $0x208] sm:$0xff]  ;;  %v556_v32 = vld [vmem:[#allocation4 + $0x200] sm:$0xff] }
 0x210   :  { %v286_v38 = vmul.f32 %v1100_v30, %v284_v35  ;;  %v291_v39 = vmul.f32 %v289_v36, %v287_v33  ;;  %v558_v30 = vld [vmem:[#allocation4 + $0x210] sm:$0xff]  ;;  %v555_v33 = vld [vmem:[#allocation4 + $0x1f8] sm:$0xff]  ;;  %v553_v36 = vld [vmem:[#allocation4 + $0x1e8] sm:$0xff] }
 0x211   :  { %v554_v35 = vld [vmem:[#allocation4 + $0x1f0] sm:$0xff] }
 0x212   :  { %v290_v40 = vmul.f32 %v288_v37, %v286_v38  ;;  %v295_v42 = vsel %vm267_vm1, %v291_v39, %v264_v10  ;;  %v552_v37 = vld [vmem:[#allocation4 + $0x1e0] sm:$0xff]  ;;  %v551_v38 = vld [vmem:[#allocation4 + $0x1d8] sm:$0xff]  ;;  %v550_v39 = vld [vmem:[#allocation4 + $0x1d0] sm:$0xff] }
 0x214   :  { %v294_v41 = vsel %vm267_vm1, %v290_v40, %v259_v13  ;;  %v549_v40 = vld [vmem:[#allocation4 + $0x1c8] sm:$0xff] }
 0x215   :  { %972 = vmatprep.mubr.f32.mxu0 %v294_v41  ;;  %v548_v41 = vld [vmem:[#allocation4 + $0x1c0] sm:$0xff] }
 0x216   :  { %973 = vmatmul.mubr.f32.vlgmr.msra.gmra.mxu0 %v295_v42  ;;  %v547_v42 = vld [vmem:[#allocation4 + $0x1b8] sm:$0xff] }
 0x217   :  { %1011 = vmatpush3.msra.mxu0 %v559_v29  ;;  %v670_v29 = vld [vmem:[#allocation4 + $0x230] sm:$0xff] }
 0x218   :  { %1012 = vmatprep.subr.mxu0 %v558_v30 }
 0x219   :  { %1013 = vmatpush3.msra.mxu0 %v558_v30  ;;  %v669_v30 = vld [vmem:[#allocation4 + $0x228] sm:$0xff] }
 0x21a   :  { %1014 = vmatprep.subr.mxu0 %v557_v31 }
 0x21b   :  { %1015 = vmatpush3.msra.mxu0 %v557_v31  ;;  %v668_v31 = vld [vmem:[#allocation4 + $0x220] sm:$0xff] }
 0x21c   :  { %1016 = vmatprep.subr.mxu0 %v556_v32 }
 0x21d   :  { %1017 = vmatpush3.msra.mxu0 %v556_v32  ;;  %v562_v32 = vsub.s32 4, %v1234_v23 }
 0x21e   :  { %1018 = vmatprep.subr.mxu0 %v555_v33 }
 0x21f   :  { %1019 = vmatpush3.msra.mxu0 %v555_v33  ;;  %v563_v33 = vrot.slane %v1237_v25, %v562_v32 }
 0x220   :  { %1020 = vmatprep.subr.mxu0 %v554_v35 }
 0x221   :  { %1021 = vmatpush3.msra.mxu0 %v554_v35 }
 0x222   :  { %1022 = vmatprep.subr.mxu0 %v553_v36 }
 0x223   :  { %1023 = vmatpush3.msra.mxu0 %v553_v36 }
 0x224   :  { %1024 = vmatprep.subr.mxu0 %v552_v37 }
 0x225   :  { %1025 = vmatpush3.msra.mxu0 %v552_v37 }
 0x226   :  { %1026 = vmatprep.subr.mxu0 %v551_v38 }
 0x227   :  { %1027 = vmatpush3.msra.mxu0 %v551_v38 }
 0x228   :  { %1028 = vmatprep.subr.mxu0 %v550_v39 }
 0x229   :  { %1029 = vmatpush3.msra.mxu0 %v550_v39 }
 0x22a   :  { %1030 = vmatprep.subr.mxu0 %v549_v40 }
 0x22b   :  { %1031 = vmatpush3.msra.mxu0 %v549_v40 }
 0x22c   :  { %1032 = vmatprep.subr.mxu0 %v548_v41 }
 0x22d   :  { %1033 = vmatpush3.msra.mxu0 %v548_v41 }
 0x22e   :  { %1034 = vmatprep.subr.mxu0 %v547_v42 }
 0x22f   :  { %1035 = vmatpush3.msra.mxu0 %v547_v42 }
 0x230   :  { %1036 = vmatprep.subr.mxu0 %v546_v43 }
 0x231   :  { %1037 = vmatpush3.msra.mxu0 %v546_v43 }
 0x232   :  { %1038 = vmatprep.subr.mxu0 %v545_v44 }
 0x233   :  { %1039 = vmatpush3.msra.mxu0 %v545_v44 }
 0x234   :  { %1040 = vmatprep.subr.mxu0 %v544_v22 }
 0x235   :  { %1041 = vmatpush3.msra.mxu0 %v544_v22 }
 0x2d6   :  { %v974_v60 = vpop.f32.mrf.mxu0 }
 0x2d7   :  { %v388_v61 = vadd.f32 %v974_v60, %v315_v59 }
 0x2d8   :  { %v382_v62 = vpop.f32.mrf.mxu0 }
 0x2d9   :  { %v393_v63 = vmin.f32 %v388_v61, 20.0  ;;  %v383_v0 = vadd.f32 %v382_v62, %v315_v59 }
 0x2db   :  { %v396_v1 = vmul.f32 1.442695, %v393_v63  ;;  %v392_v2 = vmin.f32 %v383_v0, 20.0 }
 0x2dd   :  { %1101 = vpow2.f32 %v396_v1  ;;  %v394_v3 = vmul.f32 1.442695, %v392_v2 }
 0x2df   :  { %1103 = vpow2.f32 %v394_v3 }
 0x2ea   :  { %v1102_v4 = vpop.eup %1101 }
 0x2eb   :  { %v399_v5 = vadd.f32 2.0, %v1102_v4 }
 0x2ec   :  { %v1104_v6 = vpop.eup %1103 }
 0x2ed   :  { %v401_v7 = vmul.f32 %v1102_v4, %v399_v5  ;;  %v398_v8 = vadd.f32 2.0, %v1104_v6 }
 0x2ef   :  { %v403_v9 = vadd.f32 2.0, %v401_v7  ;;  %v400_v10 = vmul.f32 %v1104_v6, %v398_v8  ;;  %v413_v19 = vmul.f32 %v401_v7, %v388_v61 }
 0x2f1   :  { %1105 = vrcp.f32 %v403_v9  ;;  %v402_v11 = vadd.f32 2.0, %v400_v10  ;;  %v412_v20 = vmul.f32 %v400_v10, %v383_v0 }
 0x2f3   :  { %1107 = vrcp.f32 %v402_v11 }
 0x2fe   :  { %v1106_v12 = vpop.eup %1105 }
 0x2ff   :  { %v407_v13 = vmul.f32 %v1106_v12, %v403_v9 }
 0x300   :  { %v1108_v14 = vpop.eup %1107 }
 0x301   :  { %v409_v15 = vsub.f32 2.0, %v407_v13  ;;  %v406_v16 = vmul.f32 %v1108_v14, %v402_v11  ;;  %v683_v13 = vld [vmem:[#allocation4 + $0x298] sm:$0xff] }
 0x302   :  { %1045 = vmatprep.subr.mxu1 %v683_v13 }
 0x303   :  { %v411_v17 = vmul.f32 %v1106_v12, %v409_v15  ;;  %v408_v18 = vsub.f32 2.0, %v406_v16  ;;  %v681_v15 = vld [vmem:[#allocation4 + $0x288] sm:$0xff]  ;;  %v680_v16 = vld [vmem:[#allocation4 + $0x280] sm:$0xff] }
 0x305   :  { %v410_v21 = vmul.f32 %v1108_v14, %v408_v18  ;;  %v415_v24 = vmul.f32 %v413_v19, %v411_v17  ;;  %v682_v14 = vld [vmem:[#allocation4 + $0x290] sm:$0xff]  ;;  %v679_v17 = vld [vmem:[#allocation4 + $0x278] sm:$0xff]  ;;  %v677_v19 = vld [vmem:[#allocation4 + $0x268] sm:$0xff] }
 0x306   :  { %v678_v18 = vld [vmem:[#allocation4 + $0x270] sm:$0xff] }
 0x307   :  { %v414_v26 = vmul.f32 %v412_v20, %v410_v21  ;;  %v419_v28 = vsel %vm391_vm2, %v415_v24, %v388_v61  ;;  %v676_v20 = vld [vmem:[#allocation4 + $0x260] sm:$0xff]  ;;  %v675_v21 = vld [vmem:[#allocation4 + $0x258] sm:$0xff]  ;;  %v674_v24 = vld [vmem:[#allocation4 + $0x250] sm:$0xff] }
 0x309   :  { %v418_v27 = vsel %vm391_vm2, %v414_v26, %v383_v0  ;;  %v673_v26 = vld [vmem:[#allocation4 + $0x248] sm:$0xff] }
 0x30a   :  { %1007 = vmatprep.mubr.f32.mxu1 %v418_v27  ;;  %v672_v27 = vld [vmem:[#allocation4 + $0x240] sm:$0xff] }
 0x30b   :  { %1008 = vmatmul.mubr.f32.vlgmr.msra.gmra.mxu1 %v419_v28  ;;  %v671_v28 = vld [vmem:[#allocation4 + $0x238] sm:$0xff] }
 0x30c   :  { %1046 = vmatpush3.msra.mxu1 %v683_v13 }
 0x30d   :  { %1047 = vmatprep.subr.mxu1 %v682_v14 }
 0x30e   :  { %1048 = vmatpush3.msra.mxu1 %v682_v14 }
 0x30f   :  { %1049 = vmatprep.subr.mxu1 %v681_v15 }
 0x310   :  { %1050 = vmatpush3.msra.mxu1 %v681_v15 }
 0x311   :  { %1051 = vmatprep.subr.mxu1 %v680_v16 }
 0x312   :  { %1052 = vmatpush3.msra.mxu1 %v680_v16 }
 0x313   :  { %1053 = vmatprep.subr.mxu1 %v679_v17 }
 0x314   :  { %1054 = vmatpush3.msra.mxu1 %v679_v17 }
 0x315   :  { %1055 = vmatprep.subr.mxu1 %v678_v18 }
 0x316   :  { %1056 = vmatpush3.msra.mxu1 %v678_v18 }
 0x317   :  { %1057 = vmatprep.subr.mxu1 %v677_v19 }
 0x318   :  { %1058 = vmatpush3.msra.mxu1 %v677_v19 }
 0x319   :  { %1059 = vmatprep.subr.mxu1 %v676_v20 }
 0x31a   :  { %1060 = vmatpush3.msra.mxu1 %v676_v20 }
 0x31b   :  { %1061 = vmatprep.subr.mxu1 %v675_v21 }
 0x31c   :  { %1062 = vmatpush3.msra.mxu1 %v675_v21 }
 0x31d   :  { %1063 = vmatprep.subr.mxu1 %v674_v24 }
 0x31e   :  { %1064 = vmatpush3.msra.mxu1 %v674_v24 }
 0x31f   :  { %1065 = vmatprep.subr.mxu1 %v673_v26 }
 0x320   :  { %1066 = vmatpush3.msra.mxu1 %v673_v26 }
 0x321   :  { %1067 = vmatprep.subr.mxu1 %v672_v27 }
 0x322   :  { %1068 = vmatpush3.msra.mxu1 %v672_v27 }
 0x323   :  { %1069 = vmatprep.subr.mxu1 %v671_v28 }
 0x324   :  { %1070 = vmatpush3.msra.mxu1 %v671_v28 }
 0x325   :  { %1071 = vmatprep.subr.mxu1 %v670_v29 }
 0x326   :  { %1072 = vmatpush3.msra.mxu1 %v670_v29 }
 0x327   :  { %1073 = vmatprep.subr.mxu1 %v669_v30 }
 0x328   :  { %1074 = vmatpush3.msra.mxu1 %v669_v30 }
 0x329   :  { %1075 = vmatprep.subr.mxu1 %v668_v31 }
 0x32a   :  { %1076 = vmatpush3.msra.mxu1 %v668_v31 }
 0x3cb   :  { %v1009_v47 = vpop.f32.mrf.mxu1 }
 0x3cc   :  { %v512_v48 = vadd.f32 %v1009_v47, %v439_v46 }
 0x3cd   :  { %v506_v49 = vpop.f32.mrf.mxu1 }
 0x3ce   :  { %v517_v50 = vmin.f32 %v512_v48, 20.0  ;;  %v507_v51 = vadd.f32 %v506_v49, %v439_v46 }
 0x3d0   :  { %v520_v52 = vmul.f32 1.442695, %v517_v50  ;;  %v516_v53 = vmin.f32 %v507_v51, 20.0 }
 0x3d2   :  { %1109 = vpow2.f32 %v520_v52  ;;  %v518_v54 = vmul.f32 1.442695, %v516_v53 }
 0x3d4   :  { %1111 = vpow2.f32 %v518_v54 }
 0x3df   :  { %v1110_v55 = vpop.eup %1109 }
 0x3e0   :  { %v523_v56 = vadd.f32 2.0, %v1110_v55 }
 0x3e1   :  { %v1112_v57 = vpop.eup %1111 }
 0x3e2   :  { %v525_v58 = vmul.f32 %v1110_v55, %v523_v56  ;;  %v522_v59 = vadd.f32 2.0, %v1112_v57 }
 0x3e4   :  { %v527_v60 = vadd.f32 2.0, %v525_v58  ;;  %v524_v61 = vmul.f32 %v1112_v57, %v522_v59  ;;  %v537_v6 = vmul.f32 %v525_v58, %v512_v48 }
 0x3e6   :  { %1113 = vrcp.f32 %v527_v60  ;;  %v526_v62 = vadd.f32 2.0, %v524_v61  ;;  %v536_v7 = vmul.f32 %v524_v61, %v507_v51 }
 0x3e8   :  { %1115 = vrcp.f32 %v526_v62 }
 0x3f3   :  { %v1114_v63 = vpop.eup %1113 }
 0x3f4   :  { %v531_v0 = vmul.f32 %v1114_v63, %v527_v60 }
 0x3f5   :  { %v1116_v1 = vpop.eup %1115 }
 0x3f6   :  { %v533_v2 = vsub.f32 2.0, %v531_v0  ;;  %v530_v3 = vmul.f32 %v1116_v1, %v526_v62  ;;  %v686_v0 = vsub.s32 5, %v1234_v23 }
 0x3f8   :  { %v535_v4 = vmul.f32 %v1114_v63, %v533_v2  ;;  %v532_v5 = vsub.f32 2.0, %v530_v3 }
 0x3fa   :  { %v534_v8 = vmul.f32 %v1116_v1, %v532_v5  ;;  %v539_v9 = vmul.f32 %v537_v6, %v535_v4  ;;  %v687_v1 = vrot.slane %v1237_v25, %v686_v0 }
 0x3fc   :  { %v538_v10 = vmul.f32 %v536_v7, %v534_v8  ;;  %v543_v12 = vsel %vm515_vm3, %v539_v9, %v512_v48 }
 0x3fe   :  { %v542_v11 = vsel %vm515_vm3, %v538_v10, %v507_v51 }
 0x3ff   :  { %1042 = vmatprep.mubr.f32.mxu0 %v542_v11 }
 0x400   :  { %1043 = vmatmul.mubr.f32.vlgmr.msra.gmra.mxu0 %v543_v12 }
 0x4c0   :  { %v1044_v35 = vpop.f32.mrf.mxu0 }
 0x4c1   :  { %v636_v36 = vadd.f32 %v1044_v35, %v563_v33 }
 0x4c2   :  { %v630_v37 = vpop.f32.mrf.mxu0 }
 0x4c3   :  { %v641_v38 = vmin.f32 %v636_v36, 20.0  ;;  %v631_v39 = vadd.f32 %v630_v37, %v563_v33 }
 0x4c5   :  { %v644_v40 = vmul.f32 1.442695, %v641_v38  ;;  %v640_v41 = vmin.f32 %v631_v39, 20.0 }
 0x4c7   :  { %1117 = vpow2.f32 %v644_v40  ;;  %v642_v42 = vmul.f32 1.442695, %v640_v41 }
 0x4c9   :  { %1119 = vpow2.f32 %v642_v42 }
 0x4d4   :  { %v1118_v43 = vpop.eup %1117 }
 0x4d5   :  { %v647_v44 = vadd.f32 2.0, %v1118_v43 }
 0x4d6   :  { %v1120_v22 = vpop.eup %1119 }
 0x4d7   :  { %v649_v45 = vmul.f32 %v1118_v43, %v647_v44  ;;  %v646_v46 = vadd.f32 2.0, %v1120_v22 }
 0x4d9   :  { %v651_v47 = vadd.f32 2.0, %v649_v45  ;;  %v648_v48 = vmul.f32 %v1120_v22, %v646_v46  ;;  %v661_v57 = vmul.f32 %v649_v45, %v636_v36 }
 0x4db   :  { %1121 = vrcp.f32 %v651_v47  ;;  %v650_v49 = vadd.f32 2.0, %v648_v48  ;;  %v660_v58 = vmul.f32 %v648_v48, %v631_v39 }
 0x4dd   :  { %1123 = vrcp.f32 %v650_v49 }
 0x4e8   :  { %v1122_v50 = vpop.eup %1121 }
 0x4e9   :  { %v655_v51 = vmul.f32 %v1122_v50, %v651_v47 }
 0x4ea   :  { %v1124_v52 = vpop.eup %1123 }
 0x4eb   :  { %v657_v53 = vsub.f32 2.0, %v655_v51  ;;  %v654_v54 = vmul.f32 %v1124_v52, %v650_v49 }
 0x4ed   :  { %v659_v55 = vmul.f32 %v1122_v50, %v657_v53  ;;  %v656_v56 = vsub.f32 2.0, %v654_v54 }
 0x4ef   :  { %v658_v59 = vmul.f32 %v1124_v52, %v656_v56  ;;  %v663_v60 = vmul.f32 %v661_v57, %v659_v55 }
 0x4f1   :  { %v662_v61 = vmul.f32 %v660_v58, %v658_v59  ;;  %v667_v63 = vsel %vm639_vm4, %v663_v60, %v636_v36 }
 0x4f3   :  { %v666_v62 = vsel %vm639_vm4, %v662_v61, %v631_v39 }
 0x4f4   :  { %1077 = vmatprep.mubr.f32.mxu1 %v666_v62 }
 0x4f5   :  { %1078 = vmatmul.mubr.f32.vlgmr.msra.gmra.mxu1 %v667_v63 }
 0x5b5   :  { %v1079_v2 = vpop.f32.mrf.mxu1 }
 0x5b6   :  { %v760_v3 = vadd.f32 %v1079_v2, %v687_v1 }
 0x5b7   :  { %v754_v4 = vpop.f32.mrf.mxu1 }
 0x5b8   :  { %v764_v5 = vmin.f32 %v760_v3, 20.0  ;;  %v755_v6 = vadd.f32 %v754_v4, %v687_v1 }
 0x5ba   :  { %v767_v7 = vmul.f32 1.442695, %v764_v5  ;;  %v763_v8 = vmin.f32 %v755_v6, 20.0 }
 0x5bc   :  { %1125 = vpow2.f32 %v767_v7  ;;  %v765_v9 = vmul.f32 1.442695, %v763_v8 }
 0x5be   :  { %1127 = vpow2.f32 %v765_v9 }
 0x5c9   :  { %v1126_v34 = vpop.eup %1125 }
 0x5ca   :  { %v770_v10 = vadd.f32 2.0, %v1126_v34 }
 0x5cb   :  { %v1128_v11 = vpop.eup %1127 }
 0x5cc   :  { %v772_v12 = vmul.f32 %v1126_v34, %v770_v10  ;;  %v769_v13 = vadd.f32 2.0, %v1128_v11 }
 0x5ce   :  { %v774_v14 = vadd.f32 2.0, %v772_v12  ;;  %v771_v15 = vmul.f32 %v1128_v11, %v769_v13  ;;  %v784_v21 = vmul.f32 %v772_v12, %v760_v3 }
 0x5d0   :  { %1129 = vrcp.f32 %v774_v14  ;;  %v773_v23 = vadd.f32 2.0, %v771_v15  ;;  %v783_v28 = vmul.f32 %v771_v15, %v755_v6 }
 0x5d2   :  { %1131 = vrcp.f32 %v773_v23 }
 0x5dd   :  { %v1130_v25 = vpop.eup %1129 }
 0x5de   :  { %v778_v16 = vmul.f32 %v1130_v25, %v774_v14 }
 0x5df   :  { %v1132_v17 = vpop.eup %1131 }
 0x5e0   :  { %v780_v18 = vsub.f32 2.0, %v778_v16  ;;  %v777_v19 = vmul.f32 %v1132_v17, %v773_v23 }
 0x5e2   :  { %v782_v20 = vmul.f32 %v1130_v25, %v780_v18  ;;  %v779_v24 = vsub.f32 2.0, %v777_v19 }
 0x5e4   :  { %v786_v26 = vmul.f32 %v784_v21, %v782_v20  ;;  %v781_v27 = vmul.f32 %v1132_v17, %v779_v24 }
 0x5e6   :  { %789 = vst.msk [vmem:[%s1266_s3 + $0x8] sm:$0xff] %vm787_vm5, %v786_v26  ;;  %v785_v29 = vmul.f32 %v783_v28, %v781_v27 }
 0x5e8   :  { %788 = vst.msk [vmem:[%s1266_s3] sm:$0xff] %vm787_vm5, %v785_v29 }
 0x5e9   :  { %794 = vsyncpa [#allocation3], 1 }
 0x5ea   :  { %795 = vsyncpa [#allocation5], 1 }

</bundles_post_ra>
